<compile_context>
chip_gen: v6e
topology: v6e:2x2x1
jax: 0.10.0
libtpu: 0.0.40
codegen_flags: <defaults>
</compile_context>

<pallas_src>
import functools
import math

import jax
import jax.numpy as jnp
from jax.experimental import pallas as pl
from jax.experimental.pallas import tpu as pltpu


# ---------------------------------------------------------------------------
# Tile selection: dtype-aware sublane pack, VMEM tile budget, and a minimum
# grid-block count so megacore / pipelining stay busy.
# ---------------------------------------------------------------------------
_SUBLANE_PACK = {4: 8, 2: 16, 1: 32}


def _choose_row_tile(rows, lane_width, itemsize, batch,
                     target_bytes=2 * 1024 * 1024, min_blocks=4):
    """Largest TL such that TL divides rows, TL % sublane_pack == 0
    (or TL == rows), one (TL, lane_width) tile fits target_bytes, and
    batch * (rows // TL) >= min_blocks when feasible."""
    pack = _SUBLANE_PACK.get(itemsize, 8)
    budget_rows = max(pack, target_bytes // max(1, lane_width * itemsize))
    want_splits = -(-min_blocks // max(1, batch))            # ceil
    if rows >= want_splits * pack:
        mc_rows = max(pack, rows // want_splits)
    else:
        mc_rows = rows
    cap = min(budget_rows, mc_rows, rows)
    t = (cap // pack) * pack
    while t >= pack:
        if rows % t == 0:
            return t
        t -= pack
    return rows  # full-extent block along this dim is always legal


# ---------------------------------------------------------------------------
# Kernel (lane-packed path, 128 % C == 0):
#   x block:   (1, TL, 128)   each 128-lane row holds R = 128//C positions
#   a/b block: (1, 1, 128)    pre-combined affine (ln_w*gamma, ln_b*gamma+beta)
#   m block:   (128, 128)     block-diagonal ones (bf16), MXU segment-sum
# ---------------------------------------------------------------------------
def _adain_packed_kernel(x_ref, a_ref, b_ref, m_ref, o_ref, *, eps, inv_c):
    x = x_ref[...].astype(jnp.float32)                  # (1, TL, 128)
    tl = x.shape[1]
    x2 = x.reshape(tl, 128)
    m = m_ref[...]                                      # (128, 128) bf16 0/1

    # Segment sums on the MXU. Hi/lo bf16 split keeps the mean f32-accurate
    # regardless of the default matmul precision.
    x_hi = x2.astype(jnp.bfloat16)
    x_lo = (x2 - x_hi.astype(jnp.float32)).astype(jnp.bfloat16)
    seg_sum = (jnp.dot(x_hi, m, preferred_element_type=jnp.float32)
               + jnp.dot(x_lo, m, preferred_element_type=jnp.float32))
    mean = seg_sum * inv_c
    xc = x2 - mean

    sq = xc * xc
    sq_hi = sq.astype(jnp.bfloat16)
    sq_lo = (sq - sq_hi.astype(jnp.float32)).astype(jnp.bfloat16)
    var = (jnp.dot(sq_hi, m, preferred_element_type=jnp.float32)
           + jnp.dot(sq_lo, m, preferred_element_type=jnp.float32)) * inv_c

    inv = jax.lax.rsqrt(var + eps)                      # EUP slot
    a = a_ref[...].astype(jnp.float32).reshape(1, 128)
    b = b_ref[...].astype(jnp.float32).reshape(1, 128)
    out = xc * inv * a + b
    o_ref[...] = out.reshape(1, tl, 128).astype(o_ref.dtype)


# ---------------------------------------------------------------------------
# Fallback kernel (any C): LayerNorm reduction along the C lane axis.
# ---------------------------------------------------------------------------
def _adain_fallback_kernel(x_ref, a_ref, b_ref, o_ref, *, eps):
    x = x_ref[...].astype(jnp.float32)                  # (1, TL, C)
    mean = jnp.mean(x, axis=-1, keepdims=True)
    xc = x - mean
    var = jnp.mean(xc * xc, axis=-1, keepdims=True)     # biased var (torch LN)
    inv = jax.lax.rsqrt(var + eps)                      # EUP slot
    out = xc * inv * a_ref[...].astype(jnp.float32) + b_ref[...].astype(jnp.float32)
    o_ref[...] = out.astype(o_ref.dtype)


# ---------------------------------------------------------------------------
# Wrapper == AdaptiveInstanceNorm.forward(input, actv)
# ---------------------------------------------------------------------------
def adaptive_instance_norm(x, actv, ln_weight, ln_bias, style_weight, style_bias,
                           *, input_resolution, lr_mul=1.0):
    B, L, C = x.shape
    H, W = input_resolution
    assert L == H * W, "input feature has wrong size"
    style_dim = actv.shape[-1]
    assert style_weight.shape == (2 * C, style_dim)

    # Original module: nn.LayerNorm(in_channel, style_dim) -> eps = style_dim.
    eps = float(style_dim)
    scale = 1.0 / math.sqrt(style_dim) * lr_mul

    # EqualLinear (tiny [B,S]@[S,2C]) + per-(batch,channel) affine pre-combine.
    # Done inline in XLA: a dedicated pallas_call here is pure dispatch / HBM
    # round-trip overhead. dot_general with contracting dims ((1,),(1,)) avoids
    # materializing style_weight.T.
    style = jax.lax.dot_general(
        actv.astype(jnp.float32),
        style_weight.astype(jnp.float32) * scale,
        (((1,), (1,)), ((), ()))) + style_bias.astype(jnp.float32) * lr_mul
    gamma = style[:, :C]
    beta = style[:, C:]
    # out = ((x-mu)/sigma * ln_w + ln_b) * gamma + beta  ==  xhat * A + Bv
    A = ln_weight.astype(jnp.float32)[None, :] * gamma            # [B, C]
    Bv = ln_bias.astype(jnp.float32)[None, :] * gamma + beta      # [B, C]

    itemsize = jnp.dtype(x.dtype).itemsize
    lane_packed = (128 % C == 0) and (L % (128 // C) == 0)

    if lane_packed:
        # ---- lane-dense path: (B, L, C) -> (B, L/R, 128), R = 128 // C ------
        R = 128 // C
        Lp = L // R
        xp = x.reshape(B, Lp, 128)                                 # free reshape
        a_t = jnp.tile(A, (1, R)).reshape(B, 1, 128)
        b_t = jnp.tile(Bv, (1, R)).reshape(B, 1, 128)
        seg = jnp.arange(128, dtype=jnp.int32) // C
        seg_mat = (seg[:, None] == seg[None, :]).astype(jnp.bfloat16)

        TL = _choose_row_tile(Lp, 128, itemsize, B)
        assert Lp % TL == 0
        grid = (B, Lp // TL)

        tile_bytes = TL * 128 * itemsize
        vmem_limit = int(min(32 * 1024 * 1024,
                             max(4 * 1024 * 1024, 4 * tile_bytes + (1 << 20))))
        cost = pl.CostEstimate(
            flops=int((4 * 2 * 128 + 16) * B * Lp * 128),
            transcendentals=int(B * Lp * 128),
            bytes_accessed=int(2 * B * L * C * itemsize
                               + (2 * B * 128 + 128 * 128) * 4),
        )

        out_p = pl.pallas_call(
            functools.partial(_adain_packed_kernel, eps=eps, inv_c=1.0 / C),
            out_shape=jax.ShapeDtypeStruct((B, Lp, 128), x.dtype),
            grid=grid,
            in_specs=[
                pl.BlockSpec((1, TL, 128), lambda b, l: (b, l, 0)),   # x packed
                pl.BlockSpec((1, 1, 128), lambda b, l: (b, 0, 0)),    # A tiled
                pl.BlockSpec((1, 1, 128), lambda b, l: (b, 0, 0)),    # Bv tiled
                pl.BlockSpec((128, 128), lambda b, l: (0, 0)),        # seg ones
            ],
            out_specs=pl.BlockSpec((1, TL, 128), lambda b, l: (b, l, 0)),
            compiler_params=pltpu.CompilerParams(
                dimension_semantics=("parallel", "parallel"),
                vmem_limit_bytes=vmem_limit,
            ),
            cost_estimate=cost,
        )(xp, a_t, b_t, seg_mat)
        return out_p.reshape(B, L, C)

    # ---- fallback path (128 % C != 0): reduce along the C lane axis ---------
    a_t = A.reshape(B, 1, C)
    b_t = Bv.reshape(B, 1, C)
    TL = _choose_row_tile(L, C, itemsize, B)
    assert L % TL == 0
    grid = (B, L // TL)
    tile_bytes = TL * C * itemsize
    vmem_limit = int(min(32 * 1024 * 1024,
                         max(4 * 1024 * 1024, 4 * tile_bytes + (1 << 20))))
    cost = pl.CostEstimate(
        flops=int(10 * B * L * C),
        transcendentals=int(B * L),
        bytes_accessed=int(2 * B * L * C * itemsize + 2 * B * C * 4),
    )
    return pl.pallas_call(
        functools.partial(_adain_fallback_kernel, eps=eps),
        out_shape=jax.ShapeDtypeStruct((B, L, C), x.dtype),
        grid=grid,
        in_specs=[
            pl.BlockSpec((1, TL, C), lambda b, l: (b, l, 0)),
            pl.BlockSpec((1, 1, C), lambda b, l: (b, 0, 0)),
            pl.BlockSpec((1, 1, C), lambda b, l: (b, 0, 0)),
        ],
        out_specs=pl.BlockSpec((1, TL, C), lambda b, l: (b, l, 0)),
        compiler_params=pltpu.CompilerParams(
            dimension_semantics=("parallel", "parallel"),
            vmem_limit_bytes=vmem_limit,
        ),
        cost_estimate=cost,
    )(x, a_t, b_t)


# ---------------------------------------------------------------------------
# Pure-JAX reference for verification (mirrors the PyTorch forward).
# ---------------------------------------------------------------------------
def _reference(x, actv, ln_weight, ln_bias, style_weight, style_bias,
               *, input_resolution, lr_mul=1.0):
    B, L, C = x.shape
    style_dim = actv.shape[-1]
    eps = float(style_dim)
    scale = 1.0 / math.sqrt(style_dim) * lr_mul

    xf = x.astype(jnp.float32)
    mean = xf.mean(-1, keepdims=True)
    var = ((xf - mean) ** 2).mean(-1, keepdims=True)
    norm = (xf - mean) / jnp.sqrt(var + eps)
    norm = norm * ln_weight.astype(jnp.float32) + ln_bias.astype(jnp.float32)

    style = (actv.astype(jnp.float32)
             @ (style_weight.astype(jnp.float32) * scale).T
             + style_bias.astype(jnp.float32) * lr_mul)
    gamma, beta = style[:, :C], style[:, C:]
    out = norm * gamma[:, None, :] + beta[:, None, :]
    return out.astype(x.dtype)


if __name__ == "__main__":
    key = jax.random.PRNGKey(0)
    B, C, H, W = 2, 32, 16, 16          # in_channel=32, spatial 16x16
    style_dim = 64
    L = H * W

    k1, k2, k3, k4, k5, k6 = jax.random.split(key, 6)
    x = jax.random.normal(k1, (B, L, C), dtype=jnp.float32)
    actv = jax.random.normal(k2, (B, style_dim), dtype=jnp.float32)
    ln_weight = 1.0 + 0.1 * jax.random.normal(k3, (C,), dtype=jnp.float32)
    ln_bias = 0.1 * jax.random.normal(k4, (C,), dtype=jnp.float32)
    style_weight = jax.random.normal(k5, (2 * C, style_dim), dtype=jnp.float32)
    style_bias = 0.1 * jax.random.normal(k6, (2 * C,), dtype=jnp.float32)

    out = adaptive_instance_norm(
        x, actv, ln_weight, ln_bias, style_weight, style_bias,
        input_resolution=(H, W))
    jax.block_until_ready(out)

    ref = _reference(
        x, actv, ln_weight, ln_bias, style_weight, style_bias,
        input_resolution=(H, W))

    assert out.shape == (B, L, C) and out.dtype == x.dtype
    err = float(jnp.max(jnp.abs(out.astype(jnp.float32) - ref.astype(jnp.float32))))
    assert err < 1e-4, f"max abs err {err}"

    print("KERNEL_OK")
</pallas_src>

<mosaic_0001>
module attributes {stable_mosaic.version = 11 : i64} {
  func.func @_adain_packed_kernel(%arg0: i32, %arg1: i32, %arg2: memref<1x32x128xf32, #tpu.memory_space<vmem>>, %arg3: memref<1x1x128xf32, #tpu.memory_space<vmem>>, %arg4: memref<1x1x128xf32, #tpu.memory_space<vmem>>, %arg5: memref<128x128xbf16, #tpu.memory_space<vmem>>, %arg6: memref<1x32x128xf32, #tpu.memory_space<vmem>>) attributes {dimension_semantics = [#tpu.dimension_semantics<parallel>, #tpu.dimension_semantics<parallel>], iteration_bounds = array<i64: 2, 2>, scalar_prefetch = 0 : i64, scratch_operands = 0 : i64, tpu.core_type = #tpu.core_type<tc>, window_params = [{transform_indices = @transform_0, window_bounds = array<i64: 1, 32, 128>}, {transform_indices = @transform_1, window_bounds = array<i64: 1, 1, 128>}, {transform_indices = @transform_2, window_bounds = array<i64: 1, 1, 128>}, {pipeline_mode = #tpu.pipeline_mode<synchronous>, transform_indices = @transform_3, window_bounds = array<i64: 128, 128>}, {transform_indices = @transform_4, window_bounds = array<i64: 1, 32, 128>}]} {
    %c0 = arith.constant 0 : index
    %c0_0 = arith.constant 0 : index
    %c0_1 = arith.constant 0 : index
    %0 = vector.load %arg2[%c0, %c0_0, %c0_1] : memref<1x32x128xf32, #tpu.memory_space<vmem>>, vector<1x32x128xf32>
    %1 = vector.shape_cast %0 : vector<1x32x128xf32> to vector<32x128xf32>
    %c0_2 = arith.constant 0 : index
    %c0_3 = arith.constant 0 : index
    %2 = vector.load %arg5[%c0_2, %c0_3] : memref<128x128xbf16, #tpu.memory_space<vmem>>, vector<128x128xbf16>
    %3 = arith.truncf %1 : vector<32x128xf32> to vector<32x128xbf16>
    %4 = arith.extf %3 : vector<32x128xbf16> to vector<32x128xf32>
    %5 = arith.subf %1, %4 : vector<32x128xf32>
    %6 = arith.truncf %5 : vector<32x128xf32> to vector<32x128xbf16>
    %cst = arith.constant dense<0.000000e+00> : vector<32x128xf32>
    %7 = tpu.matmul %3, %2, %cst {dimension_numbers = #tpu.dot_dimension_numbers<[1], [0], [0], [1], [0, 0, 1, 1], [], []>} : vector<32x128xbf16>, vector<128x128xbf16>, vector<32x128xf32> -> vector<32x128xf32>
    %cst_4 = arith.constant dense<0.000000e+00> : vector<32x128xf32>
    %8 = tpu.matmul %6, %2, %cst_4 {dimension_numbers = #tpu.dot_dimension_numbers<[1], [0], [0], [1], [0, 0, 1, 1], [], []>} : vector<32x128xbf16>, vector<128x128xbf16>, vector<32x128xf32> -> vector<32x128xf32>
    %9 = arith.addf %7, %8 : vector<32x128xf32>
    %cst_5 = arith.constant 3.125000e-02 : f32
    %10 = vector.broadcast %cst_5 : f32 to vector<32x128xf32>
    %11 = arith.mulf %9, %10 : vector<32x128xf32>
    %12 = arith.subf %1, %11 : vector<32x128xf32>
    %13 = arith.mulf %12, %12 : vector<32x128xf32>
    %14 = arith.truncf %13 : vector<32x128xf32> to vector<32x128xbf16>
    %15 = arith.extf %14 : vector<32x128xbf16> to vector<32x128xf32>
    %16 = arith.subf %13, %15 : vector<32x128xf32>
    %17 = arith.truncf %16 : vector<32x128xf32> to vector<32x128xbf16>
    %cst_6 = arith.constant dense<0.000000e+00> : vector<32x128xf32>
    %18 = tpu.matmul %14, %2, %cst_6 {dimension_numbers = #tpu.dot_dimension_numbers<[1], [0], [0], [1], [0, 0, 1, 1], [], []>} : vector<32x128xbf16>, vector<128x128xbf16>, vector<32x128xf32> -> vector<32x128xf32>
    %cst_7 = arith.constant dense<0.000000e+00> : vector<32x128xf32>
    %19 = tpu.matmul %17, %2, %cst_7 {dimension_numbers = #tpu.dot_dimension_numbers<[1], [0], [0], [1], [0, 0, 1, 1], [], []>} : vector<32x128xbf16>, vector<128x128xbf16>, vector<32x128xf32> -> vector<32x128xf32>
    %20 = arith.addf %18, %19 : vector<32x128xf32>
    %cst_8 = arith.constant 3.125000e-02 : f32
    %21 = vector.broadcast %cst_8 : f32 to vector<32x128xf32>
    %22 = arith.mulf %20, %21 : vector<32x128xf32>
    %cst_9 = arith.constant 6.400000e+01 : f32
    %23 = vector.broadcast %cst_9 : f32 to vector<32x128xf32>
    %24 = arith.addf %22, %23 : vector<32x128xf32>
    %25 = math.rsqrt %24 : vector<32x128xf32>
    %c0_10 = arith.constant 0 : index
    %c0_11 = arith.constant 0 : index
    %c0_12 = arith.constant 0 : index
    %26 = vector.load %arg3[%c0_10, %c0_11, %c0_12] : memref<1x1x128xf32, #tpu.memory_space<vmem>>, vector<1x1x128xf32>
    %27 = vector.shape_cast %26 : vector<1x1x128xf32> to vector<1x128xf32>
    %c0_13 = arith.constant 0 : index
    %c0_14 = arith.constant 0 : index
    %c0_15 = arith.constant 0 : index
    %28 = vector.load %arg4[%c0_13, %c0_14, %c0_15] : memref<1x1x128xf32, #tpu.memory_space<vmem>>, vector<1x1x128xf32>
    %29 = vector.shape_cast %28 : vector<1x1x128xf32> to vector<1x128xf32>
    %30 = arith.mulf %12, %25 : vector<32x128xf32>
    %31 = vector.broadcast %27 : vector<1x128xf32> to vector<32x128xf32>
    %32 = arith.mulf %30, %31 : vector<32x128xf32>
    %33 = vector.broadcast %29 : vector<1x128xf32> to vector<32x128xf32>
    %34 = arith.addf %32, %33 : vector<32x128xf32>
    %35 = vector.shape_cast %34 : vector<32x128xf32> to vector<1x32x128xf32>
    %c0_16 = arith.constant 0 : index
    %c0_17 = arith.constant 0 : index
    %c0_18 = arith.constant 0 : index
    %36 = vector.load %arg6[%c0_16, %c0_17, %c0_18] : memref<1x32x128xf32, #tpu.memory_space<vmem>>, vector<1x32x128xf32>
    tpu.vector_store %arg6[%c0_16, %c0_17, %c0_18], %35 {strides = array<i32>} : memref<1x32x128xf32, #tpu.memory_space<vmem>>, vector<1x32x128xf32>,
    return
  }
  func.func @transform_0(%arg0: i32, %arg1: i32) -> (i32, i32, i32) {
    %c0_i32 = arith.constant 0 : i32
    %c0_i32_0 = arith.constant 0 : i32
    return %arg0, %arg1, %c0_i32 : i32, i32, i32
  }
  func.func @transform_1(%arg0: i32, %arg1: i32) -> (i32, i32, i32) {
    %c0_i32 = arith.constant 0 : i32
    %c0_i32_0 = arith.constant 0 : i32
    %c0_i32_1 = arith.constant 0 : i32
    return %arg0, %c0_i32, %c0_i32_0 : i32, i32, i32
  }
  func.func @transform_2(%arg0: i32, %arg1: i32) -> (i32, i32, i32) {
    %c0_i32 = arith.constant 0 : i32
    %c0_i32_0 = arith.constant 0 : i32
    %c0_i32_1 = arith.constant 0 : i32
    return %arg0, %c0_i32, %c0_i32_0 : i32, i32, i32
  }
  func.func @transform_3(%arg0: i32, %arg1: i32) -> (i32, i32) {
    %c0_i32 = arith.constant 0 : i32
    %c0_i32_0 = arith.constant 0 : i32
    %c0_i32_1 = arith.constant 0 : i32
    return %c0_i32, %c0_i32_0 : i32, i32
  }
  func.func @transform_4(%arg0: i32, %arg1: i32) -> (i32, i32, i32) {
    %c0_i32 = arith.constant 0 : i32
    %c0_i32_0 = arith.constant 0 : i32
    return %arg0, %arg1, %c0_i32 : i32, i32, i32
  }
}

</mosaic_0001>

<bundles_post_ra>
// kernel: tpu_custom_call.1
= control target key start
LH: loop header
LB: loop body
LE: loop exit
PB: predicated region body
PF: predicated region fallthrough
CT: control target
= control target key end

     0   :  { %s1643_s0 = inlined_call_operand.hbm [shape: f32[2,64,128], index: 0, kind: input, shape index: {}]   ;;  %s1644_s1 = inlined_call_operand.hbm [shape: f32[2,1,128], index: 1, kind: input, shape index: {}]   ;;  %s1645_s2 = inlined_call_operand.vmem [shape: f32[2,1,128], index: 2, kind: input, shape index: {}]   ;;  %s1646_s3 = inlined_call_operand.hbm [shape: bf16[128,128], index: 3, kind: input, shape index: {}]   ;;  %s1647_s4 = inlined_call_operand.hbm [shape: f32[2,64,128], index: 4, kind: output, shape index: {}]  }
   0x1   :  { %1659 = sst [smem:[#allocation20_spill]] %s1645_s2 }
   0x2   :  { %1660 = sst [smem:[#allocation21_spill]] %s1646_s3 }
   0x3   :  { %1661 = sst [smem:[#allocation22_spill]] %s1647_s4 }
   0x4   :  { %9 = vsyncpa [#allocation3], 0 }
   0x5   :  { %11 = vsyncpa [#allocation3 + $0x1], 0 }
   0x6   :  { %12 = vsyncpa [#allocation6], 0 }
   0x7   :  { %14 = vsyncpa [#allocation6 + $0x1], 0 }
   0x8   :  { %15 = vsyncpa [#allocation4], 0 }
   0x9   :  { %17 = vsyncpa [#allocation4 + $0x1], 0  ;;  %s1322_s15 = smov 0   ;;  %s1324_s16 = smov 0  }
   0xa   :  { %s1326_s17 = smov 0   ;;  %s1328_s18 = smov 0  }
   0xb   :  { %s1330_s19 = smov 0   ;;  %s1332_s20 = smov 0  }
   0xc   :  { %s1334_s21 = smov 0   ;;  %s1336_s22 = smov 0  }
   0xd   :  { %s1338_s23 = smov 0   ;;  %s1340_s24 = smov 0  }
   0xe   :  { %s1342_s25 = smov 0  }
   0xf LB: > { %1662 = sst [smem:[#allocation13_spill]] %s1257_s18  ;;  %s1378_s26 = sadd.s32 4294967295, %s1285_s25   ;;  %s1285_s25 = sphi %s1342_s25, %s23_s25   ;;  %s1281_s24 = sphi %s1340_s24, %s1702_s24   ;;  %s1277_s23 = sphi %s1338_s23, %s1693_s23   ;;  %s1273_s22 = sphi %s1336_s22, %s1701_s22   ;;  %s1269_s21 = sphi %s1334_s21, %s1692_s21   ;;  %s1265_s20 = sphi %s1332_s20, %s1700_s20   ;;  %s1261_s19 = sphi %s1330_s19, %s1699_s19   ;;  %s1257_s18 = sphi %s1328_s18, %s1698_s18   ;;  %s1253_s17 = sphi %s1326_s17, %s1697_s17   ;;  %s1249_s16 = sphi %s1324_s16, %s1696_s16   ;;  %s1245_s15 = sphi %s1322_s15, %s1695_s15  }
  0x10   : > { %1663 = sst [smem:[#allocation14_spill]] %s1269_s21  ;;  %s786_s27 = sadd.s32 4294967294, %s1285_s25  }
  0x11   : > { %1664 = sst [smem:[#allocation15_spill]] %s1277_s23  ;;  %p57_p0 = scmp.ne.s32.totalorder %s1261_s19, %s1257_s18 }
  0x12   : > { %p1656_p1 = scmp.eq.s32.totalorder %s1378_s26, 0  ;;  %p162_p3 = scmp.eq.s32.totalorder %s786_s27, 3 }
  0x13   : > { %p787_p5 = scmp.ge.s32.totalorder %s1285_s25, 1  ;;  %p169_p7 = scmp.lt.s32.totalorder %s1285_s25, 5 }
  0x14   : > { %p1387_p4 = por %p1656_p1, %p57_p0  ;;  %p1392_p6 = por %p162_p3, %p57_p0 }
  0x15   : > { %p1397_p8 = pnand %p787_p5, %p169_p7  ;;  %s1287_s5 = smov [#allocation7]  }
  0x16   : > { %s1666_s29 = scalar_select %p1392_p6, 1, 0 }
  0x17   : > { %s181_s6 = sshll.u32 %s1287_s5, 4  ;;  %p945_p9 = pneg %p1397_p8  ;;  %s182_s6 = int_to_ptr.vmem [resolvable:$true] %s181_s6 }
  0x18   : > { %1667 = sst [smem:[#allocation16_spill]] %s1666_s29  ;;  %s1086_s7 = scalar_lea.vmem %s182_s6, 1024 }
  0x19   : > { %p946_p10 = pnand %p945_p9, %p1656_p1  ;;  %p1087_p12 = scmp.ne.s32.totalorder %s182_s6, %s1086_s7 }
  0x1a   : > { %p1094_p3 = scmp.lt.s32.totalorder %s182_s6, %s182_s6  ;;  %p1095_p2 = scmp.lt.s32.totalorder %s1086_s7, %s1086_s7 }
  0x1b   : > { %p1077_p11 = pneg %p946_p10 }
  0x1c   : > { %p1096_p6 = por %p1095_p2, %p1094_p3 }
  0x1d   : > { %p1089_p13 = pnand %p1087_p12, %p1077_p11 }
  0x1f   : > { %p1090_p0 = pneg %p1089_p13 }
  0x21   : > { %p1097_p5 = pnand %p1096_p6, %p1090_p0 }
  0x23   : > { %1100 = shalt.err (!%p1097_p5)
}
  0x24   : > { %s1288_s8 = smov 64   ;;  %s1289_s9 = smov 4  }
  0x25   : > { %s1669_s3 = sld [smem:[#allocation21_spill]]  ;;  %s32_s12 = sadd.s32 1, %s1277_s23 }
  0x26   : > { %p33_p2 = scmp.ge.s32.totalorder %s32_s12, 2  ;;  %s35_s13 = sadd.s32 1, %s1281_s24 }
  0x27   : > { %s44_s14 = sadd.s32 1, %s1265_s20  ;;  %p51_p6 = scmp.ne.s32.totalorder %s1265_s20, %s1261_s19 }
  0x28   : > { %s1704_s12 = smov (%p33_p2, %s32_s12), 0  ;;  %s1706_s13 = smov (!%p33_p2, %s35_s13), %s1281_s24 }
  0x29   : > { %1670 = sst [smem:[#allocation17_spill]] %s1704_s12  ;;  %s40_s27 = ssub.s32 %s1277_s23, %s1704_s12 }
  0x2a   : > { %p1657_p7 = scmp.eq.s32.totalorder %s1285_s25, 0  ;;  %p37_p9 = scmp.ge.s32.totalorder %s1706_s13, 2 }
  0x2b   : > { %948 = dma.hbm_to_vmem [thread:$0]  (!%p946_p10), %s1669_s3, 1024, %s182_s6, [#allocation6], %s1288_s8, %s1288_s8, %s1289_s9  }
  0x2c   : > { %p1671_p11 = scmp.eq.s32.totalorder %s1378_s26, 3  ;;  %p1427_p10 = por %p1657_p7, %p51_p6 }
  0x2d   : > { %p961_p13 = scmp.lt.s32.totalorder %s1285_s25, 4  ;;  %s1708_s13 = smov (%p37_p9, %s1706_s13), 0 }
  0x2e   : > { %p1421_p12 = por %p1671_p11, %p51_p6  ;;  %1675 = sst [smem:[#allocation19_spill]] %s1708_s13 }
  0x2f   : > { %s195_s7 = sand.u32 1, %s1265_s20   ;;  %s791_s8 = sshll.u32 %s1277_s23, 2 }
  0x30   : > { %s1672_s5 = scalar_select %p1421_p12, 1, 0 }
  0x31   : > { %s1438_s9 = ssub.s32 %s1281_s24, %s1708_s13  ;;  %s790_s11 = sshll.u32 %s195_s7, 5 }
  0x32   : > { %1673 = sst [smem:[#allocation18_spill]] %s1672_s5  ;;  %s41_s10 = sor.u32 %s40_s27, %s1438_s9 }
  0x33   : > { %p42_p3 = scmp.eq.s32.totalorder %s41_s10, 0  ;;  %s792_s3 = sshll.u32 %s1281_s24, 3 }
  0x34   : > { %s205_s29 = sadd.s32 %s792_s3, %s791_s8  ;;  %s199_s18 = scalar_lea.vmem [#allocation2], %s790_s11 }
  0x35   : > { %s1444_s12 = scalar_select %p42_p3, %s1265_s20, %s44_s14  }
  0x36   : > { %s208_s4 = sshll.u32 %s199_s18, 4  ;;  %s793_s5 = sshll.u32 %s205_s29, 7  ;;  %s209_s4 = int_to_ptr.vmem [resolvable:$true] %s208_s4 }
  0x37   : > { %s207_s23 = scalar_lea.hbm %s1643_s0, %s793_s5  ;;  %p1453_p5 = pnand %p961_p13, %p1427_p10 }
  0x38   : > { %s196_s27 = scalar_lea.sflag [#allocation3], %s195_s7  ;;  %s1114_s14 = scalar_lea.vmem %s209_s4, 512 }
  0x39   : > { %p1103_p2 = pneg %p1453_p5  ;;  %p1115_p6 = scmp.ne.s32.totalorder %s209_s4, %s1114_s14 }
  0x3a   : > { %s1290_s3 = smov [#allocation2]  }
  0x3b   : > { %p1117_p9 = pnand %p1115_p6, %p1103_p2  ;;  %s1119_s18 = sshll.u32 %s1290_s3, 4  ;;  %s1120_s18 = int_to_ptr.vmem [resolvable:$false] %s1119_s18 }
  0x3c   : > { %s1121_s29 = scalar_lea.vmem %s1120_s18, 1024  ;;  %p1122_p3 = scmp.lt.s32.totalorder %s209_s4, %s1120_s18 }
  0x3d   : > { %p1118_p11 = pneg %p1117_p9  ;;  %p1123_p1 = scmp.lt.s32.totalorder %s1121_s29, %s1114_s14 }
  0x3f   : > { %p1124_p7 = por %p1123_p1, %p1122_p3 }
  0x41   : > { %p1125_p0 = pnand %p1124_p7, %p1118_p11 }
  0x43   : > { %1128 = shalt.err (!%p1125_p0)
}
  0x44   : > { %s1291_s2 = smov 128   ;;  %s1292_s21 = smov 8  }
  0x45   : > { %952 = dma.hbm_to_vmem [thread:$0]  (!%p1453_p5), %s207_s23, 512, %s209_s4, %s196_s27, %s1291_s2, %s1291_s2, %s1292_s21  }
  0x46   : > { %s70_s5 = sadd.s32 1, %s1253_s17  ;;  %p1677_p1 = scmp.eq.s32.totalorder %s1438_s9, 0 }
  0x47   : > { %p77_p7 = scmp.ne.s32.totalorder %s1253_s17, %s1249_s16  ;;  %p83_p10 = scmp.ne.s32.totalorder %s1249_s16, %s1245_s15 }
  0x48   : > { %s1465_s6 = scalar_select %p1677_p1, %s1253_s17, %s70_s5  }
  0x49   : > { %s218_s7 = sand.u32 1, %s1285_s25   ;;  %s220_s8 = sand.u32 1, %s1253_s17  }
  0x4a   : > { %p1678_p0 = scmp.eq.s32.totalorder %s1285_s25, 0  ;;  %p1679_p6 = scmp.eq.s32.totalorder %s1378_s26, 0 }
  0x4b   : > { %s794_s11 = sshll.u32 %s1281_s24, 4  ;;  %s221_s14 = scalar_lea.vmem [#allocation5], %s220_s8 }
  0x4c   : > { %p79_p2 = por %p77_p7, %p1678_p0  ;;  %p1477_p9 = por %p83_p10, %p1679_p6 }
  0x4d   : > { %s228_s3 = sshll.u32 %s221_s14, 4  ;;  %s226_s23 = scalar_lea.hbm %s1644_s1, %s794_s11  ;;  %s229_s3 = int_to_ptr.vmem [resolvable:$true] %s228_s3 }
  0x4e   : > { %p1487_p5 = pnand %p961_p13, %p79_p2  ;;  %s219_s9 = scalar_lea.sflag [#allocation6], %s218_s7 }
  0x4f   : > { %s1142_s27 = scalar_lea.vmem %s229_s3, 16  ;;  %s1293_s18 = smov [#allocation5]  }
  0x50   : > { %p1131_p11 = pneg %p1487_p5  ;;  %p1143_p3 = scmp.ne.s32.totalorder %s229_s3, %s1142_s27 }
  0x51   : > { %s1147_s29 = sshll.u32 %s1293_s18, 4  ;;  %s1148_s29 = int_to_ptr.vmem [resolvable:$false] %s1147_s29 }
  0x52   : > { %p1145_p1 = pnand %p1143_p3, %p1131_p11  ;;  %s1149_s2 = scalar_lea.vmem %s1148_s29, 32 }
  0x53   : > { %p1150_p10 = scmp.lt.s32.totalorder %s229_s3, %s1148_s29  ;;  %p1151_p0 = scmp.lt.s32.totalorder %s1149_s2, %s1142_s27 }
  0x54   : > { %p1146_p7 = pneg %p1145_p1 }
  0x55   : > { %p1152_p6 = por %p1151_p0, %p1150_p10 }
  0x57   : > { %p1153_p12 = pnand %p1152_p6, %p1146_p7 }
  0x59   : > { %1156 = shalt.err (!%p1153_p12)
}
  0x5a   : > { %955 = dma.hbm_to_vmem [thread:$0]  (!%p1487_p5), %s226_s23, 16, %s229_s3, %s219_s9  }
  0x5b   : > { %243 = sbr.rel (%p1397_p8) target bundleno = 591 (0x24f), region = 36  ;;  %s1498_s21 = sand.u32 (!%p1397_p8), 1, %s1261_s19  }
  0x5c   : > { %s796_s5 = sshll.u32 (!%p1397_p8), %s1498_s21, 5  ;;  %s246_s7 = scalar_lea.sflag (!%p1397_p8), [#allocation3], %s1498_s21 }
  0x5d   : > { %s1504_s8 = scalar_lea.vmem (!%p1397_p8), [#allocation2], %s796_s5 }
  0x60   : > { %1228 = dma.done.wait (%p1387_p4), %s246_s7, 512  }
  0x61   : > { %1230 = vsyncadd (%p1387_p4), %s246_s7, 4294966784  ;;  %s254_s30 = sand.u32 1, %s1378_s26   ;;  %s256_s11 = sand.u32 1, %s1249_s16  }
  0x62   : > { %s255_s14 = scalar_lea.sflag [#allocation6], %s254_s30  ;;  %s1512_s3 = scalar_lea.vmem [#allocation5], %s256_s11 }
  0x63   : > { %1232 = dma.done.wait (%p1477_p9), %s255_s14, 16  }
  0x64   : > { %1234 = vsyncadd (%p1477_p9), %s255_s14, 4294967280  ;;  %p1682_p8 = scmp.eq.s32.totalorder %s1378_s26, 0 }
  0x66   : > { %1236 = dma.done.wait (%p1682_p8), [#allocation6], 1024   ;;  %p1683_p12 = pmov %p1682_p8 }
  0x67   : > { %v1059_v0 = vld [vmem:[#allocation7 + $0x38] sm:$0xff]   ;;  %v1522_v1 = vld [vmem:[#allocation7 + $0x30] sm:$0xff]   ;;  %v1061_v2 = vld [vmem:[#allocation7 + $0x28] sm:$0xff]   ;;  %s1684_s26 = sld [smem:[#allocation14_spill]]  ;;  %p294_p4 = scmp.lt.s32.totalorder %s1273_s22, 1 }
  0x68   : > { %1238 = vsyncadd (%p1683_p12), [#allocation6], 4294966272  ;;  %855 = vmatprep.subr.bf16.mxu0 %v1059_v0  ;;  %875 = vmatprep.subr.bf16.mxu1 %v1059_v0  ;;  %v1062_v3 = vld [vmem:[#allocation7 + $0x20] sm:$0xff]   ;;  %v1063_v9 = vld [vmem:[#allocation7 + $0x18] sm:$0xff]   ;;  %s1685_s4 = sld [smem:[#allocation20_spill]]  ;;  %s811_s9 = sshll.u32 %s1273_s22, 3 }
  0x69   : > { %856 = vmatpush3.bf16.msra.mxu0 %v1059_v0  ;;  %876 = vmatpush3.bf16.msra.mxu1 %v1059_v0  ;;  %v1529_v4 = vld [vmem:[%s1504_s8] sm:$0xff]  ;;  %v1532_v5 = vld [vmem:[%s1504_s8 + $0x8] sm:$0xff]  ;;  %v1539_v13 = vld [vmem:[%s1504_s8 + $0x10] sm:$0xff]  ;;  %s295_s28 = scalar_select %p294_p4, %s1273_s22, 1 }
  0x6a   : > { %857 = vmatprep.subr.bf16.mxu0 %v1522_v1  ;;  %877 = vmatprep.subr.bf16.mxu1 %v1522_v1  ;;  %v319_v6 = vpack.c.bf16 %v1532_v5, %v1529_v4  ;;  %v1542_v14 = vld [vmem:[%s1504_s8 + $0x18] sm:$0xff]  ;;  %v1065_v17 = vld [vmem:[#allocation7 + $0x8] sm:$0xff]   ;;  %v1066_v20 = vld [vmem:[#allocation7] sm:$0xff]   ;;  %s1686_s18 = sld [smem:[#allocation18_spill]]  ;;  %s292_s29 = scalar_lea.vmem [#allocation8], %s796_s5 }
  0x6b   : > { %v1064_v15 = vld [vmem:[#allocation7 + $0x10] sm:$0xff]   ;;  %v320_v16 = vpack.c.bf16 %v1542_v14, %v1539_v13  ;;  %s657_s2 = sshll.u32 %s292_s29, 4  ;;  %s1687_s30 = sld [smem:[#allocation22_spill]]  ;;  %s1581_s2 = int_to_ptr.vmem [resolvable:$true] %s657_s2 }
  0x6c   : > { %v321_v7 = vunpack.c.l.bf16 %v319_v6  ;;  %v322_v8 = vunpack.c.h.bf16 %v319_v6  ;;  %891 = vmatprep.mubr.bf16.mxu1 %v319_v6  ;;  %s642_s5 = scalar_lea.sflag [#allocation4], %s1498_s21  ;;  %s1157_s14 = scalar_lea.vmem %s1581_s2, 512 }
  0x6d   : > { %858 = vmatpush3.bf16.msra.mxu0 %v1522_v1  ;;  %878 = vmatpush3.bf16.msra.mxu1 %v1522_v1  ;;  %v323_v18 = vunpack.c.l.bf16 %v320_v16  ;;  %v324_v19 = vunpack.c.h.bf16 %v320_v16  ;;  %s810_s15 = sshll.u32 %s1684_s26, 2  ;;  %p1158_p13 = scmp.ne.s32.totalorder %s1581_s2, %s1157_s14 }
  0x6e   : > { %859 = vmatprep.subr.bf16.mxu0 %v1061_v2  ;;  %879 = vmatprep.subr.bf16.mxu1 %v1061_v2  ;;  %v325_v10 = vsub.f32 %v1529_v4, %v321_v7  ;;  %v326_v11 = vsub.f32 %v1532_v5, %v322_v8  ;;  %s296_s23 = scalar_lea.vmem %s1685_s4, %s295_s28  ;;  %s654_s27 = sadd.s32 %s811_s9, %s810_s15 }
  0x6f   : > { %v327_v21 = vsub.f32 %v1539_v13, %v323_v18  ;;  %v328_v22 = vsub.f32 %v1542_v14, %v324_v19  ;;  %s812_s22 = sshll.u32 %s654_s27, 7 }
  0x70   : > { %v329_v12 = vpack.c.bf16 %v326_v11, %v325_v10  ;;  %p1688_p2 = scmp.ne.s32.totalorder %s1686_s18, 0 }
  0x71   : > { %860 = vmatpush3.bf16.msra.mxu0 %v1061_v2  ;;  %880 = vmatpush3.bf16.msra.mxu1 %v1061_v2  ;;  %v330_v23 = vpack.c.bf16 %v328_v22, %v327_v21  ;;  %s1579_s11 = scalar_lea.hbm %s1687_s30, %s812_s22 }
  0x72   : > { %861 = vmatprep.subr.bf16.mxu0 %v1062_v3  ;;  %881 = vmatprep.subr.bf16.mxu1 %v1062_v3  ;;  %p1159_p9 = pnand %p1158_p13, %p1688_p2 }
  0x73   : > { %871 = vmatprep.mubr.bf16.mxu0 %v329_v12 }
  0x74   : > { %p1160_p5 = pneg %p1159_p9 }
  0x75   : > { %862 = vmatpush3.bf16.msra.mxu0 %v1062_v3  ;;  %882 = vmatpush3.bf16.msra.mxu1 %v1062_v3 }
  0x76   : > { %863 = vmatprep.subr.bf16.mxu0 %v1063_v9  ;;  %883 = vmatprep.subr.bf16.mxu1 %v1063_v9 }
  0x79   : > { %864 = vmatpush3.bf16.msra.mxu0 %v1063_v9  ;;  %884 = vmatpush3.bf16.msra.mxu1 %v1063_v9 }
  0x7a   : > { %865 = vmatprep.subr.bf16.mxu0 %v1064_v15  ;;  %885 = vmatprep.subr.bf16.mxu1 %v1064_v15 }
  0x7d   : > { %866 = vmatpush3.bf16.msra.mxu0 %v1064_v15  ;;  %886 = vmatpush3.bf16.msra.mxu1 %v1064_v15 }
  0x7e   : > { %867 = vmatprep.subr.bf16.mxu0 %v1065_v17  ;;  %887 = vmatprep.subr.bf16.mxu1 %v1065_v17 }
  0x81   : > { %868 = vmatpush3.bf16.msra.mxu0 %v1065_v17  ;;  %888 = vmatpush3.bf16.msra.mxu1 %v1065_v17 }
  0x82   : > { %869 = vmatprep.subr.bf16.mxu0 %v1066_v20  ;;  %889 = vmatprep.subr.bf16.mxu1 %v1066_v20 }
  0x85   : > { %870 = vmatpush3.bf16.msra.mxu0 %v1066_v20  ;;  %890 = vmatpush3.bf16.msra.mxu1 %v1066_v20 }
  0x86   : > { %915 = vmatprep.subr.bf16.mxu1 %v1059_v0  ;;  %895 = vmatprep.subr.bf16.mxu0 %v1059_v0 }
  0x88   : > { %872 = vmatmul.mubr.bf16.vlgmr.msra.gmra.mxu0 %v330_v23  ;;  %892 = vmatmul.mubr.bf16.vlgmr.msra.gmra.mxu1 %v320_v16 }
  0x89   : > { %916 = vmatpush3.bf16.msra.mxu1 %v1059_v0  ;;  %896 = vmatpush3.bf16.msra.mxu0 %v1059_v0 }
  0x8a   : > { %917 = vmatprep.subr.bf16.mxu1 %v1522_v1  ;;  %897 = vmatprep.subr.bf16.mxu0 %v1522_v1 }
  0x8d   : > { %918 = vmatpush3.bf16.msra.mxu1 %v1522_v1  ;;  %898 = vmatpush3.bf16.msra.mxu0 %v1522_v1 }
  0x8e   : > { %919 = vmatprep.subr.bf16.mxu1 %v1061_v2  ;;  %899 = vmatprep.subr.bf16.mxu0 %v1061_v2 }
  0x91   : > { %920 = vmatpush3.bf16.msra.mxu1 %v1061_v2  ;;  %900 = vmatpush3.bf16.msra.mxu0 %v1061_v2 }
  0x92   : > { %921 = vmatprep.subr.bf16.mxu1 %v1062_v3  ;;  %901 = vmatprep.subr.bf16.mxu0 %v1062_v3 }
  0x95   : > { %922 = vmatpush3.bf16.msra.mxu1 %v1062_v3  ;;  %902 = vmatpush3.bf16.msra.mxu0 %v1062_v3 }
  0x96   : > { %923 = vmatprep.subr.bf16.mxu1 %v1063_v9  ;;  %903 = vmatprep.subr.bf16.mxu0 %v1063_v9 }
  0x99   : > { %924 = vmatpush3.bf16.msra.mxu1 %v1063_v9  ;;  %904 = vmatpush3.bf16.msra.mxu0 %v1063_v9 }
  0x9a   : > { %925 = vmatprep.subr.bf16.mxu1 %v1064_v15  ;;  %905 = vmatprep.subr.bf16.mxu0 %v1064_v15 }
  0x9d   : > { %926 = vmatpush3.bf16.msra.mxu1 %v1064_v15  ;;  %906 = vmatpush3.bf16.msra.mxu0 %v1064_v15 }
  0x9e   : > { %927 = vmatprep.subr.bf16.mxu1 %v1065_v17  ;;  %907 = vmatprep.subr.bf16.mxu0 %v1065_v17 }
  0xa1   : > { %928 = vmatpush3.bf16.msra.mxu1 %v1065_v17  ;;  %908 = vmatpush3.bf16.msra.mxu0 %v1065_v17  ;;  %v807_v17 = vld [vmem:[%s1512_s3] ss:$0 sm:$0xff]  ;;  %s1294_s3 = smov [#allocation8]  }
  0xa2   : > { %929 = vmatprep.subr.bf16.mxu1 %v1066_v20  ;;  %909 = vmatprep.subr.bf16.mxu0 %v1066_v20  ;;  %s1161_s26 = sshll.u32 %s1294_s3, 4  ;;  %s1162_s26 = int_to_ptr.vmem [resolvable:$false] %s1161_s26 }
  0xa3   : > { %s1163_s28 = scalar_lea.vmem %s1162_s26, 1024  ;;  %p1164_p11 = scmp.lt.s32.totalorder %s1581_s2, %s1162_s26 }
  0xa4   : > { %p1165_p3 = scmp.lt.s32.totalorder %s1163_s28, %s1157_s14 }
  0xa5   : > { %930 = vmatpush3.bf16.msra.mxu1 %v1066_v20  ;;  %910 = vmatpush3.bf16.msra.mxu0 %v1066_v20  ;;  %v808_v20 = vld [vmem:[%s296_s23] ss:$0 sm:$0xff] }
  0xa6   : > { %p1166_p1 = por %p1165_p3, %p1164_p11 }
  0xa8   : > { %p1167_p7 = pnand %p1166_p1, %p1160_p5 }
 0x148   : > { %v873_v24 = vpop.f32.mrf.mxu0  ;;  %v893_v25 = vpop.f32.mrf.mxu1 }
 0x149   : > { %v471_v26 = vadd.f32 %v893_v25, %v873_v24 }
 0x14a   : > { %v413_v27 = vpop.f32.mrf.mxu0  ;;  %v462_v28 = vpop.f32.mrf.mxu1 }
 0x14b   : > { %v479_v29 = vmul.f32 0.03125, %v471_v26  ;;  %v463_v30 = vadd.f32 %v462_v28, %v413_v27 }
 0x14c   : > { %v874_v31 = vpop.f32.mrf.mxu0  ;;  %v894_v32 = vpop.f32.mrf.mxu1 }
 0x14d   : > { %v477_v33 = vmul.f32 0.03125, %v463_v30  ;;  %v474_v34 = vadd.f32 %v894_v32, %v874_v31  ;;  %v483_v37 = vsub.f32 %v1539_v13, %v479_v29 }
 0x14e   : > { %v416_v35 = vpop.f32.mrf.mxu0  ;;  %v465_v36 = vpop.f32.mrf.mxu1 }
 0x14f   : > { %v480_v38 = vmul.f32 0.03125, %v474_v34  ;;  %v466_v39 = vadd.f32 %v465_v36, %v416_v35  ;;  %v481_v40 = vsub.f32 %v1529_v4, %v477_v33  ;;  %v487_v43 = vmul.f32 %v483_v37, %v483_v37 }
 0x151   : > { %v1555_v41 = vsub.f32 %v1542_v14, %v480_v38  ;;  %v478_v42 = vmul.f32 0.03125, %v466_v39  ;;  %v485_v46 = vmul.f32 %v481_v40, %v481_v40 }
 0x153   : > { %v488_v44 = vmul.f32 %v1555_v41, %v1555_v41  ;;  %v1560_v45 = vsub.f32 %v1532_v5, %v478_v42 }
 0x155   : > { %v490_v47 = vpack.c.bf16 %v488_v44, %v487_v43  ;;  %v486_v48 = vmul.f32 %v1560_v45, %v1560_v45 }
 0x157   : > { %v494_v49 = vunpack.c.h.bf16 %v490_v47  ;;  %v489_v50 = vpack.c.bf16 %v486_v48, %v485_v46  ;;  %v493_v51 = vunpack.c.l.bf16 %v490_v47 }
 0x159   : > { %931 = vmatprep.mubr.bf16.mxu1 %v489_v50  ;;  %v491_v52 = vunpack.c.l.bf16 %v489_v50  ;;  %v492_v53 = vunpack.c.h.bf16 %v489_v50  ;;  %v498_v54 = vsub.f32 %v488_v44, %v494_v49  ;;  %v497_v55 = vsub.f32 %v487_v43, %v493_v51 }
 0x15a   : > { %932 = vmatmul.mubr.bf16.vlgmr.msra.gmra.mxu1 %v490_v47 }
 0x15b   : > { %v495_v56 = vsub.f32 %v485_v46, %v491_v52  ;;  %v496_v57 = vsub.f32 %v486_v48, %v492_v53  ;;  %v500_v59 = vpack.c.bf16 %v498_v54, %v497_v55 }
 0x15d   : > { %v499_v58 = vpack.c.bf16 %v496_v57, %v495_v56 }
 0x15f   : > { %911 = vmatprep.mubr.bf16.mxu0 %v499_v58 }
 0x160   : > { %912 = vmatmul.mubr.bf16.vlgmr.msra.gmra.mxu0 %v500_v59 }
 0x21a   : > { %v933_v60 = vpop.f32.mrf.mxu1 }
 0x21c   : > { %v584_v61 = vpop.f32.mrf.mxu1 }
 0x21e   : > { %v934_v0 = vpop.f32.mrf.mxu1 }
 0x220   : > { %v913_v62 = vpop.f32.mrf.mxu0  ;;  %v587_v8 = vpop.f32.mrf.mxu1 }
 0x221   : > { %v593_v63 = vadd.f32 %v933_v60, %v913_v62 }
 0x222   : > { %v535_v1 = vpop.f32.mrf.mxu0 }
 0x223   : > { %v601_v2 = vmul.f32 0.03125, %v593_v63  ;;  %v585_v3 = vadd.f32 %v584_v61, %v535_v1 }
 0x224   : > { %v914_v4 = vpop.f32.mrf.mxu0 }
 0x225   : > { %v605_v5 = vadd.f32 64.0, %v601_v2  ;;  %v599_v6 = vmul.f32 0.03125, %v585_v3  ;;  %v596_v7 = vadd.f32 %v934_v0, %v914_v4 }
 0x226   : > { %v538_v9 = vpop.f32.mrf.mxu0 }
 0x227   : > { %1067 = vrsqrt.f32 %v605_v5  ;;  %v603_v10 = vadd.f32 64.0, %v599_v6  ;;  %v602_v11 = vmul.f32 0.03125, %v596_v7  ;;  %v588_v12 = vadd.f32 %v587_v8, %v538_v9 }
 0x229   : > { %1069 = vrsqrt.f32 %v603_v10  ;;  %v606_v13 = vadd.f32 64.0, %v602_v11  ;;  %v600_v14 = vmul.f32 0.03125, %v588_v12 }
 0x22b   : > { %1071 = vrsqrt.f32 %v606_v13  ;;  %v604_v15 = vadd.f32 64.0, %v600_v14 }
 0x22d   : > { %1073 = vrsqrt.f32 %v604_v15 }
 0x234   : > { %v1068_v16 = vpop.eup %1067 }
 0x235   : > { %v615_v18 = vmul.f32 %v1068_v16, %v483_v37 }
 0x236   : > { %v1070_v19 = vpop.eup %1069 }
 0x237   : > { %v625_v21 = vmul.f32 %v807_v17, %v615_v18  ;;  %v613_v22 = vmul.f32 %v1070_v19, %v481_v40 }
 0x238   : > { %v1072_v23 = vpop.eup %1071 }
 0x239   : > { %v635_v24 = vadd.f32 %v808_v20, %v625_v21  ;;  %v623_v25 = vmul.f32 %v807_v17, %v613_v22  ;;  %v616_v26 = vmul.f32 %v1072_v23, %v1555_v41 }
 0x23a   : > { %v1074_v27 = vpop.eup %1073 }
 0x23b   : > { %v633_v28 = vadd.f32 %v808_v20, %v623_v25  ;;  %v626_v29 = vmul.f32 %v807_v17, %v616_v26  ;;  %v614_v30 = vmul.f32 %v1074_v27, %v1560_v45  ;;  %639 = vst [vmem:[%s292_s29 + $0x10] sm:$0xff] %v635_v24 }
 0x23d   : > { %v636_v31 = vadd.f32 %v808_v20, %v626_v29  ;;  %v624_v32 = vmul.f32 %v807_v17, %v614_v30  ;;  %637 = vst [vmem:[%s292_s29] sm:$0xff] %v633_v28 }
 0x23f   : > { %v634_v33 = vadd.f32 %v808_v20, %v624_v32  ;;  %640 = vst [vmem:[%s292_s29 + $0x18] sm:$0xff] %v636_v31 }
 0x241   : > { %638 = vst [vmem:[%s292_s29 + $0x8] sm:$0xff] %v634_v33 }
 0x242   : > { %1170 = shalt.err (!%p1167_p7)
}
 0x243   : > { %s1171_s10 = scalar_lea.hbm %s1579_s11, 512  ;;  %s1175_s23 = scalar_lea.hbm %s1687_s30, 2048 }
 0x244   : > { %p1172_p10 = scmp.ne.s32.totalorder %s1579_s11, %s1171_s10  ;;  %p1176_p8 = scmp.lt.s32.totalorder %s1579_s11, %s1687_s30 }
 0x245   : > { %p1177_p12 = scmp.lt.s32.totalorder %s1175_s23, %s1171_s10 }
 0x246   : > { %p1173_p0 = pnand %p1172_p10, %p1688_p2 }
 0x247   : > { %p1178_p4 = por %p1177_p12, %p1176_p8 }
 0x248   : > { %p1174_p6 = pneg %p1173_p0 }
 0x24a   : > { %p1179_p13 = pnand %p1178_p4, %p1174_p6 }
 0x24c   : > { %1182 = shalt.err (!%p1179_p13)
}
 0x24d   : > { %s1295_s27 = smov 128   ;;  %s1296_s29 = smov 8  }
 0x24e   : > { %943 = dma.vmem_to_hbm [thread:$0]  (%p1688_p2), %s1581_s2, 512, %s1579_s11, %s642_s5, %s1295_s27, %s1295_s27, %s1296_s29  }
 0x24f PF: > { %s1689_s22 = sld [smem:[#allocation13_spill]]  ;;  %p963_p9 = scmp.ge.s32.totalorder %s1285_s25, 2 }
 0x250   : > { %s1690_s7 = sld [smem:[#allocation16_spill]] }
 0x255   : > { %s672_s8 = sand.u32 1, %s1689_s22  }
 0x256   : > { %p1691_p5 = scmp.ne.s32.totalorder %s1690_s7, 0  ;;  %s673_s14 = scalar_lea.sflag [#allocation4], %s672_s8 }
 0x258   : > { %p957_p11 = pnand %p963_p9, %p1691_p5 }
 0x25a   : > { %p958_p3 = pneg %p957_p11 }
 0x25c   : > { %1240 = dma.done.wait (%p958_p3), %s673_s14, 512  }
 0x25d   : > { %1242 = vsyncadd (%p958_p3), %s673_s14, 4294966784  ;;  %s23_s25 = sadd.s32 1, %s1285_s25   ;;  %s1692_s21 = sld [smem:[#allocation15_spill]] }
 0x25e   : > { %p20_p1 = scmp.ge.s32.totalorder %s23_s25, 6   ;;  %s1693_s23 = sld [smem:[#allocation17_spill]] }
 0x25f   : > { %s1694_s2 = sld [smem:[#allocation19_spill]]  ;;  %s1695_s15 = smov %s1249_s16 }
 0x260   : > { %s1696_s16 = smov %s1253_s17  ;;  %s1697_s17 = smov %s1465_s6 }
 0x261   : > { %s1698_s18 = smov %s1261_s19  ;;  %s1699_s19 = smov %s1265_s20 }
 0x262   : > { %s1700_s20 = smov %s1444_s12  ;;  %s1701_s22 = smov %s1281_s24 }
 0x263   :  { %22 = sbr.rel (!%p20_p1) target bundleno = 15 (0xf), region = 101 }
 0x265   : > { %s1702_s24 = smov %s1694_s2 }
 0x268   :  { %678 = vsyncpa [#allocation3], 1 }
 0x269   :  { %680 = vsyncpa [#allocation3 + $0x1], 1 }
 0x26a   :  { %681 = vsyncpa [#allocation6], 1 }
 0x26b   :  { %683 = vsyncpa [#allocation6 + $0x1], 1 }
 0x26c   :  { %684 = vsyncpa [#allocation4], 1 }
 0x26d   :  { %686 = vsyncpa [#allocation4 + $0x1], 1 }

</bundles_post_ra>
